<compile_context>
chip_gen: v7x
topology: tpu7x:2x2x1
jax: 0.10.0
libtpu: 0.0.40
codegen_flags: <defaults>
</compile_context>

<pallas_src>
import functools

import jax
import jax.numpy as jnp
from jax.experimental import pallas as pl
from jax.experimental.pallas import tpu as pltpu


# 3x3 taps in (dy, dx) row-major order; matches weight reshape (O, KH, KW, I).
_TAPS = tuple((dy, dx) for dy in (-1, 0, 1) for dx in (-1, 0, 1))


def _make_resblock_kernel(N, C, H, W, eps):
    M = N * H * W
    PAD = W + 1  # largest |flat shift| for a 3x3 stencil

    def conv3x3(h, w_mat, mask):
        # h: (C, M), w_mat: (C, 9*C), mask: (9*C, M)  ->  (C, M)
        # Zero-pad the flattened activation once (value concat, no VMEM
        # scratch), then take 9 static lane slices to build the im2col matrix.
        zpad = jnp.zeros((C, PAD), jnp.float32)
        hp = jnp.concatenate([zpad, h, zpad], axis=1)          # (C, M + 2*PAD)
        parts = [hp[:, PAD + dy * W + dx: PAD + dy * W + dx + M]
                 for dy, dx in _TAPS]                          # 9 x (C, M)
        patches = jnp.concatenate(parts, axis=0) * mask        # (9*C, M)
        # Single MXU matmul per conv.
        return jnp.dot(w_mat, patches, preferred_element_type=jnp.float32)

    def batchnorm(y, gamma, beta):
        # Training-mode BN over (N, H, W) == flat axis 1, biased variance,
        # fused to one normalization FMA.
        inv_m = 1.0 / M
        mean = jnp.sum(y, axis=1, keepdims=True) * inv_m        # (C, 1)
        ex2 = jnp.sum(y * y, axis=1, keepdims=True) * inv_m     # (C, 1)
        var = ex2 - mean * mean
        scale = gamma * jax.lax.rsqrt(var + eps)                # (C, 1)
        bias = beta - mean * scale
        return y * scale + bias

    def mish(h):
        # mish(x) = x * tanh(softplus(x)), softplus threshold 20 (PyTorch).
        # tanh(log1p(e)) == e*(e+2) / (e*(e+2) + 2), e = exp(x): one EUP exp +
        # one approx EUP reciprocal instead of exp + log1p + tanh.
        e = jnp.exp(jnp.minimum(h, 20.0))
        t = e * (e + 2.0)
        tsp = t * pl.reciprocal(t + 2.0, approx=True)
        tsp = jnp.where(h > 20.0, 1.0, tsp)  # tanh(x) == 1.0 in f32 for x > 20
        return h * tsp

    def kernel(x_ref, mask_ref, w1_ref, g1_ref, b1_ref, w2_ref, g2_ref, b2_ref,
               o_ref):
        x = x_ref[...]          # (C, M)  lane-dense
        mask = mask_ref[...]    # (9*C, M)
        y = conv3x3(x, w1_ref[...], mask)
        y = batchnorm(y, g1_ref[...], b1_ref[...])
        y = mish(y)
        y = conv3x3(y, w2_ref[...], mask)
        y = batchnorm(y, g2_ref[...], b2_ref[...])
        o_ref[...] = x + y      # residual add, lane-dense store

    return kernel


def _tap_masks(N, C, H, W):
    """(9*C, N*H*W) f32 masks: 1 where the shifted tap is inside the image."""
    yy = jnp.arange(H).reshape(H, 1)
    xx = jnp.arange(W).reshape(1, W)
    rows = []
    for dy, dx in _TAPS:
        valid = ((yy + dy >= 0) & (yy + dy < H) &
                 (xx + dx >= 0) & (xx + dx < W))                 # (H, W)
        flat = jnp.tile(valid.reshape(1, H * W), (N, 1)).reshape(1, N * H * W)
        rows.append(jnp.tile(flat, (C, 1)))                      # (C, M)
    return jnp.concatenate(rows, axis=0).astype(jnp.float32)     # (9*C, M)


@functools.partial(jax.jit, static_argnames=("eps",))
def resblock_forward(x, w1, g1, b1, w2, g2, b2, eps=1e-5):
    """x: (N, C, H, W); w*: (C, C, 3, 3) OIHW, no bias; g*/b*: (C,) BN affine."""
    N, C, H, W = x.shape
    M = N * H * W
    f32 = jnp.float32

    # Glue (cheap XLA ops): channel-major flat activations, matmul-ready
    # weights, column-vector BN affine params, constant tap masks.
    x_cm = jnp.transpose(x.astype(f32), (1, 0, 2, 3)).reshape(C, M)
    w1m = jnp.transpose(w1.astype(f32), (0, 2, 3, 1)).reshape(C, 9 * C)
    w2m = jnp.transpose(w2.astype(f32), (0, 2, 3, 1)).reshape(C, 9 * C)
    g1c = g1.astype(f32).reshape(C, 1)
    b1c = b1.astype(f32).reshape(C, 1)
    g2c = g2.astype(f32).reshape(C, 1)
    b2c = b2.astype(f32).reshape(C, 1)
    mask = _tap_masks(N, C, H, W)  # constant, folded by XLA

    def fullspec(shape):
        return pl.BlockSpec(shape, lambda i, _s=shape: (0,) * len(_s))

    kernel = _make_resblock_kernel(N, C, H, W, eps)

    out_cm = pl.pallas_call(
        kernel,
        out_shape=jax.ShapeDtypeStruct((C, M), f32),
        grid_spec=pltpu.PrefetchScalarGridSpec(
            num_scalar_prefetch=0,
            grid=(1,),
            in_specs=[fullspec((C, M)),          # x (channel-major flat)
                      fullspec((9 * C, M)),      # tap masks
                      fullspec((C, 9 * C)),      # conv1 weight
                      fullspec((C, 1)),          # bn1 gamma
                      fullspec((C, 1)),          # bn1 beta
                      fullspec((C, 9 * C)),      # conv2 weight
                      fullspec((C, 1)),          # bn2 gamma
                      fullspec((C, 1))],         # bn2 beta
            out_specs=fullspec((C, M)),          # lane-dense (last dim = 512)
        ),
        compiler_params=pltpu.CompilerParams(
            dimension_semantics=("arbitrary",),
        ),
    )(x_cm, mask, w1m, g1c, b1c, w2m, g2c, b2c)

    # Back to NCHW.
    return jnp.transpose(out_cm.reshape(C, N, H, W), (1, 0, 2, 3))


def _reference(x, w1, g1, b1, w2, g2, b2, eps=1e-5):
    """Pure-JAX reference of the PyTorch ResBlock forward (training-mode BN)."""
    def conv(h, w):
        return jax.lax.conv_general_dilated(
            h, w, window_strides=(1, 1), padding=((1, 1), (1, 1)),
            dimension_numbers=("NCHW", "OIHW", "NCHW"))

    def bn(h, g, b):
        mean = jnp.mean(h, axis=(0, 2, 3), keepdims=True)
        var = jnp.mean((h - mean) ** 2, axis=(0, 2, 3), keepdims=True)
        return ((h - mean) * jax.lax.rsqrt(var + eps) * g.reshape(1, -1, 1, 1)
                + b.reshape(1, -1, 1, 1))

    def mish(h):
        sp = jnp.where(h > 20.0, h, jnp.log1p(jnp.exp(jnp.minimum(h, 20.0))))
        return h * jnp.tanh(sp)

    y = conv(x, w1)
    y = bn(y, g1, b1)
    y = mish(y)
    y = conv(y, w2)
    y = bn(y, g2, b2)
    return x + y


if __name__ == "__main__":
    N, C, H, W = 2, 4, 16, 16

    key = jax.random.PRNGKey(0)
    kx, kw1, kw2, kg1, kb1, kg2, kb2 = jax.random.split(key, 7)

    x = jax.random.normal(kx, (N, C, H, W), jnp.float32)

    # conv weights (OIHW), kaiming-ish scale; no bias (BatchNorm follows).
    fan_in = C * 3 * 3
    w1 = jax.random.normal(kw1, (C, C, 3, 3), jnp.float32) / jnp.sqrt(fan_in)
    w2 = jax.random.normal(kw2, (C, C, 3, 3), jnp.float32) / jnp.sqrt(fan_in)

    # BatchNorm affine params (deterministic, non-trivial).
    g1 = 1.0 + 0.1 * jax.random.normal(kg1, (C,), jnp.float32)
    b1 = 0.1 * jax.random.normal(kb1, (C,), jnp.float32)
    g2 = 1.0 + 0.1 * jax.random.normal(kg2, (C,), jnp.float32)
    b2 = 0.1 * jax.random.normal(kb2, (C,), jnp.float32)

    out = resblock_forward(x, w1, g1, b1, w2, g2, b2)
    jax.block_until_ready(out)

    assert out.shape == (N, C, H, W) and out.dtype == jnp.float32
    ref = _reference(x, w1, g1, b1, w2, g2, b2)
    # Loose tolerance: approx EUP reciprocal in Mish + E[x^2]-mean^2 variance
    # introduce small fp-level deviations vs the exact reference.
    assert jnp.allclose(out, ref, atol=2e-2, rtol=2e-2), \
        float(jnp.max(jnp.abs(out - ref)))
    print("KERNEL_OK")
</pallas_src>

<mosaic_0001>
module attributes {stable_mosaic.version = 11 : i64} {
  func.func @kernel(%arg0: i32, %arg1: memref<4x512xf32, #tpu.memory_space<vmem>>, %arg2: memref<36x512xf32, #tpu.memory_space<vmem>>, %arg3: memref<4x36xf32, #tpu.memory_space<vmem>>, %arg4: memref<4x1xf32, #tpu.memory_space<vmem>>, %arg5: memref<4x1xf32, #tpu.memory_space<vmem>>, %arg6: memref<4x36xf32, #tpu.memory_space<vmem>>, %arg7: memref<4x1xf32, #tpu.memory_space<vmem>>, %arg8: memref<4x1xf32, #tpu.memory_space<vmem>>, %arg9: memref<4x512xf32, #tpu.memory_space<vmem>>) attributes {dimension_semantics = [#tpu.dimension_semantics<arbitrary>], iteration_bounds = array<i64: 1>, scalar_prefetch = 0 : i64, scratch_operands = 0 : i64, tpu.core_type = #tpu.core_type<tc>, window_params = [{pipeline_mode = #tpu.pipeline_mode<synchronous>, transform_indices = @transform_0, window_bounds = array<i64: 4, 512>}, {pipeline_mode = #tpu.pipeline_mode<synchronous>, transform_indices = @transform_1, window_bounds = array<i64: 36, 512>}, {pipeline_mode = #tpu.pipeline_mode<synchronous>, transform_indices = @transform_2, window_bounds = array<i64: 4, 36>}, {pipeline_mode = #tpu.pipeline_mode<synchronous>, transform_indices = @transform_3, window_bounds = array<i64: 4, 1>}, {pipeline_mode = #tpu.pipeline_mode<synchronous>, transform_indices = @transform_4, window_bounds = array<i64: 4, 1>}, {pipeline_mode = #tpu.pipeline_mode<synchronous>, transform_indices = @transform_5, window_bounds = array<i64: 4, 36>}, {pipeline_mode = #tpu.pipeline_mode<synchronous>, transform_indices = @transform_6, window_bounds = array<i64: 4, 1>}, {pipeline_mode = #tpu.pipeline_mode<synchronous>, transform_indices = @transform_7, window_bounds = array<i64: 4, 1>}, {pipeline_mode = #tpu.pipeline_mode<synchronous>, transform_indices = @transform_8, window_bounds = array<i64: 4, 512>}]} {
    %c0 = arith.constant 0 : index
    %c0_0 = arith.constant 0 : index
    %0 = vector.load %arg1[%c0, %c0_0] : memref<4x512xf32, #tpu.memory_space<vmem>>, vector<4x512xf32>
    %c0_1 = arith.constant 0 : index
    %c0_2 = arith.constant 0 : index
    %1 = vector.load %arg2[%c0_1, %c0_2] : memref<36x512xf32, #tpu.memory_space<vmem>>, vector<36x512xf32>
    %c0_3 = arith.constant 0 : index
    %c0_4 = arith.constant 0 : index
    %2 = vector.load %arg3[%c0_3, %c0_4] : memref<4x36xf32, #tpu.memory_space<vmem>>, vector<4x36xf32>
    %cst = arith.constant 0.000000e+00 : f32
    %3 = vector.broadcast %cst : f32 to vector<4x17xf32>
    %4 = tpu.concatenate %3, %0, %3 in 1 : vector<4x17xf32>, vector<4x512xf32>, vector<4x17xf32> -> vector<4x546xf32>
    %5 = vector.extract_strided_slice %4 {offsets = [0, 0], sizes = [4, 512], strides = [1, 1]} : vector<4x546xf32> to vector<4x512xf32>
    %6 = vector.extract_strided_slice %4 {offsets = [0, 1], sizes = [4, 512], strides = [1, 1]} : vector<4x546xf32> to vector<4x512xf32>
    %7 = vector.extract_strided_slice %4 {offsets = [0, 2], sizes = [4, 512], strides = [1, 1]} : vector<4x546xf32> to vector<4x512xf32>
    %8 = vector.extract_strided_slice %4 {offsets = [0, 16], sizes = [4, 512], strides = [1, 1]} : vector<4x546xf32> to vector<4x512xf32>
    %9 = vector.extract_strided_slice %4 {offsets = [0, 17], sizes = [4, 512], strides = [1, 1]} : vector<4x546xf32> to vector<4x512xf32>
    %10 = vector.extract_strided_slice %4 {offsets = [0, 18], sizes = [4, 512], strides = [1, 1]} : vector<4x546xf32> to vector<4x512xf32>
    %11 = vector.extract_strided_slice %4 {offsets = [0, 32], sizes = [4, 512], strides = [1, 1]} : vector<4x546xf32> to vector<4x512xf32>
    %12 = vector.extract_strided_slice %4 {offsets = [0, 33], sizes = [4, 512], strides = [1, 1]} : vector<4x546xf32> to vector<4x512xf32>
    %13 = vector.extract_strided_slice %4 {offsets = [0, 34], sizes = [4, 512], strides = [1, 1]} : vector<4x546xf32> to vector<4x512xf32>
    %14 = tpu.concatenate %5, %6, %7, %8, %9, %10, %11, %12, %13 in 0 : vector<4x512xf32>, vector<4x512xf32>, vector<4x512xf32>, vector<4x512xf32>, vector<4x512xf32>, vector<4x512xf32>, vector<4x512xf32>, vector<4x512xf32>, vector<4x512xf32> -> vector<36x512xf32>
    %15 = arith.mulf %14, %1 : vector<36x512xf32>
    %cst_5 = arith.constant dense<0.000000e+00> : vector<4x512xf32>
    %16 = tpu.matmul %2, %15, %cst_5 {dimension_numbers = #tpu.dot_dimension_numbers<[1], [0], [0], [1], [0, 0, 1, 1], [], []>} : vector<4x36xf32>, vector<36x512xf32>, vector<4x512xf32> -> vector<4x512xf32>
    %c0_6 = arith.constant 0 : index
    %c0_7 = arith.constant 0 : index
    %17 = vector.load %arg4[%c0_6, %c0_7] : memref<4x1xf32, #tpu.memory_space<vmem>>, vector<4x1xf32>
    %c0_8 = arith.constant 0 : index
    %c0_9 = arith.constant 0 : index
    %18 = vector.load %arg5[%c0_8, %c0_9] : memref<4x1xf32, #tpu.memory_space<vmem>>, vector<4x1xf32>
    %cst_10 = arith.constant dense<0.000000e+00> : vector<4xf32>
    %19 = vector.multi_reduction <add>, %16, %cst_10 [1] : vector<4x512xf32> to vector<4xf32>
    %20 = vector.shape_cast %19 : vector<4xf32> to vector<4x1xf32>
    %cst_11 = arith.constant 0.001953125 : f32
    %21 = vector.broadcast %cst_11 : f32 to vector<4x1xf32>
    %22 = arith.mulf %20, %21 : vector<4x1xf32>
    %23 = arith.mulf %16, %16 : vector<4x512xf32>
    %cst_12 = arith.constant dense<0.000000e+00> : vector<4xf32>
    %24 = vector.multi_reduction <add>, %23, %cst_12 [1] : vector<4x512xf32> to vector<4xf32>
    %25 = vector.shape_cast %24 : vector<4xf32> to vector<4x1xf32>
    %cst_13 = arith.constant 0.001953125 : f32
    %26 = vector.broadcast %cst_13 : f32 to vector<4x1xf32>
    %27 = arith.mulf %25, %26 : vector<4x1xf32>
    %28 = arith.mulf %22, %22 : vector<4x1xf32>
    %29 = arith.subf %27, %28 : vector<4x1xf32>
    %cst_14 = arith.constant 9.99999974E-6 : f32
    %30 = vector.broadcast %cst_14 : f32 to vector<4x1xf32>
    %31 = arith.addf %29, %30 : vector<4x1xf32>
    %32 = math.rsqrt %31 : vector<4x1xf32>
    %33 = arith.mulf %17, %32 : vector<4x1xf32>
    %34 = arith.mulf %22, %33 : vector<4x1xf32>
    %35 = arith.subf %18, %34 : vector<4x1xf32>
    %36 = vector.broadcast %33 : vector<4x1xf32> to vector<4x512xf32>
    %37 = arith.mulf %16, %36 : vector<4x512xf32>
    %38 = vector.broadcast %35 : vector<4x1xf32> to vector<4x512xf32>
    %39 = arith.addf %37, %38 : vector<4x512xf32>
    %cst_15 = arith.constant 2.000000e+01 : f32
    %40 = vector.broadcast %cst_15 : f32 to vector<4x512xf32>
    %41 = arith.minimumf %39, %40 : vector<4x512xf32>
    %42 = math.exp %41 : vector<4x512xf32>
    %cst_16 = arith.constant 2.000000e+00 : f32
    %43 = vector.broadcast %cst_16 : f32 to vector<4x512xf32>
    %44 = arith.addf %42, %43 : vector<4x512xf32>
    %45 = arith.mulf %42, %44 : vector<4x512xf32>
    %cst_17 = arith.constant 2.000000e+00 : f32
    %46 = vector.broadcast %cst_17 : f32 to vector<4x512xf32>
    %47 = arith.addf %45, %46 : vector<4x512xf32>
    %48 = tpu.reciprocal %47 {approx = true} : vector<4x512xf32> -> vector<4x512xf32>
    %49 = arith.mulf %45, %48 : vector<4x512xf32>
    %cst_18 = arith.constant 2.000000e+01 : f32
    %50 = vector.broadcast %cst_18 : f32 to vector<4x512xf32>
    %51 = arith.cmpf ogt, %39, %50 : vector<4x512xf32>
    %cst_19 = arith.constant 1.000000e+00 : f32
    %52 = vector.broadcast %cst_19 : f32 to vector<4x512xf32>
    %53 = arith.select %51, %52, %49 : vector<4x512xi1>, vector<4x512xf32>
    %54 = arith.mulf %39, %53 : vector<4x512xf32>
    %c0_20 = arith.constant 0 : index
    %c0_21 = arith.constant 0 : index
    %55 = vector.load %arg6[%c0_20, %c0_21] : memref<4x36xf32, #tpu.memory_space<vmem>>, vector<4x36xf32>
    %cst_22 = arith.constant 0.000000e+00 : f32
    %56 = vector.broadcast %cst_22 : f32 to vector<4x17xf32>
    %57 = tpu.concatenate %56, %54, %56 in 1 : vector<4x17xf32>, vector<4x512xf32>, vector<4x17xf32> -> vector<4x546xf32>
    %58 = vector.extract_strided_slice %57 {offsets = [0, 0], sizes = [4, 512], strides = [1, 1]} : vector<4x546xf32> to vector<4x512xf32>
    %59 = vector.extract_strided_slice %57 {offsets = [0, 1], sizes = [4, 512], strides = [1, 1]} : vector<4x546xf32> to vector<4x512xf32>
    %60 = vector.extract_strided_slice %57 {offsets = [0, 2], sizes = [4, 512], strides = [1, 1]} : vector<4x546xf32> to vector<4x512xf32>
    %61 = vector.extract_strided_slice %57 {offsets = [0, 16], sizes = [4, 512], strides = [1, 1]} : vector<4x546xf32> to vector<4x512xf32>
    %62 = vector.extract_strided_slice %57 {offsets = [0, 17], sizes = [4, 512], strides = [1, 1]} : vector<4x546xf32> to vector<4x512xf32>
    %63 = vector.extract_strided_slice %57 {offsets = [0, 18], sizes = [4, 512], strides = [1, 1]} : vector<4x546xf32> to vector<4x512xf32>
    %64 = vector.extract_strided_slice %57 {offsets = [0, 32], sizes = [4, 512], strides = [1, 1]} : vector<4x546xf32> to vector<4x512xf32>
    %65 = vector.extract_strided_slice %57 {offsets = [0, 33], sizes = [4, 512], strides = [1, 1]} : vector<4x546xf32> to vector<4x512xf32>
    %66 = vector.extract_strided_slice %57 {offsets = [0, 34], sizes = [4, 512], strides = [1, 1]} : vector<4x546xf32> to vector<4x512xf32>
    %67 = tpu.concatenate %58, %59, %60, %61, %62, %63, %64, %65, %66 in 0 : vector<4x512xf32>, vector<4x512xf32>, vector<4x512xf32>, vector<4x512xf32>, vector<4x512xf32>, vector<4x512xf32>, vector<4x512xf32>, vector<4x512xf32>, vector<4x512xf32> -> vector<36x512xf32>
    %68 = arith.mulf %67, %1 : vector<36x512xf32>
    %cst_23 = arith.constant dense<0.000000e+00> : vector<4x512xf32>
    %69 = tpu.matmul %55, %68, %cst_23 {dimension_numbers = #tpu.dot_dimension_numbers<[1], [0], [0], [1], [0, 0, 1, 1], [], []>} : vector<4x36xf32>, vector<36x512xf32>, vector<4x512xf32> -> vector<4x512xf32>
    %c0_24 = arith.constant 0 : index
    %c0_25 = arith.constant 0 : index
    %70 = vector.load %arg7[%c0_24, %c0_25] : memref<4x1xf32, #tpu.memory_space<vmem>>, vector<4x1xf32>
    %c0_26 = arith.constant 0 : index
    %c0_27 = arith.constant 0 : index
    %71 = vector.load %arg8[%c0_26, %c0_27] : memref<4x1xf32, #tpu.memory_space<vmem>>, vector<4x1xf32>
    %cst_28 = arith.constant dense<0.000000e+00> : vector<4xf32>
    %72 = vector.multi_reduction <add>, %69, %cst_28 [1] : vector<4x512xf32> to vector<4xf32>
    %73 = vector.shape_cast %72 : vector<4xf32> to vector<4x1xf32>
    %cst_29 = arith.constant 0.001953125 : f32
    %74 = vector.broadcast %cst_29 : f32 to vector<4x1xf32>
    %75 = arith.mulf %73, %74 : vector<4x1xf32>
    %76 = arith.mulf %69, %69 : vector<4x512xf32>
    %cst_30 = arith.constant dense<0.000000e+00> : vector<4xf32>
    %77 = vector.multi_reduction <add>, %76, %cst_30 [1] : vector<4x512xf32> to vector<4xf32>
    %78 = vector.shape_cast %77 : vector<4xf32> to vector<4x1xf32>
    %cst_31 = arith.constant 0.001953125 : f32
    %79 = vector.broadcast %cst_31 : f32 to vector<4x1xf32>
    %80 = arith.mulf %78, %79 : vector<4x1xf32>
    %81 = arith.mulf %75, %75 : vector<4x1xf32>
    %82 = arith.subf %80, %81 : vector<4x1xf32>
    %cst_32 = arith.constant 9.99999974E-6 : f32
    %83 = vector.broadcast %cst_32 : f32 to vector<4x1xf32>
    %84 = arith.addf %82, %83 : vector<4x1xf32>
    %85 = math.rsqrt %84 : vector<4x1xf32>
    %86 = arith.mulf %70, %85 : vector<4x1xf32>
    %87 = arith.mulf %75, %86 : vector<4x1xf32>
    %88 = arith.subf %71, %87 : vector<4x1xf32>
    %89 = vector.broadcast %86 : vector<4x1xf32> to vector<4x512xf32>
    %90 = arith.mulf %69, %89 : vector<4x512xf32>
    %91 = vector.broadcast %88 : vector<4x1xf32> to vector<4x512xf32>
    %92 = arith.addf %90, %91 : vector<4x512xf32>
    %93 = arith.addf %0, %92 : vector<4x512xf32>
    %c0_33 = arith.constant 0 : index
    %c0_34 = arith.constant 0 : index
    %94 = vector.load %arg9[%c0_33, %c0_34] : memref<4x512xf32, #tpu.memory_space<vmem>>, vector<4x512xf32>
    tpu.vector_store %arg9[%c0_33, %c0_34], %93 {strides = array<i32>} : memref<4x512xf32, #tpu.memory_space<vmem>>, vector<4x512xf32>,
    return
  }
  func.func @transform_0(%arg0: i32) -> (i32, i32) {
    %c0_i32 = arith.constant 0 : i32
    %c0_i32_0 = arith.constant 0 : i32
    %c0_i32_1 = arith.constant 0 : i32
    return %c0_i32, %c0_i32_0 : i32, i32
  }
  func.func @transform_1(%arg0: i32) -> (i32, i32) {
    %c0_i32 = arith.constant 0 : i32
    %c0_i32_0 = arith.constant 0 : i32
    %c0_i32_1 = arith.constant 0 : i32
    return %c0_i32, %c0_i32_0 : i32, i32
  }
  func.func @transform_2(%arg0: i32) -> (i32, i32) {
    %c0_i32 = arith.constant 0 : i32
    %c0_i32_0 = arith.constant 0 : i32
    %c0_i32_1 = arith.constant 0 : i32
    return %c0_i32, %c0_i32_0 : i32, i32
  }
  func.func @transform_3(%arg0: i32) -> (i32, i32) {
    %c0_i32 = arith.constant 0 : i32
    %c0_i32_0 = arith.constant 0 : i32
    %c0_i32_1 = arith.constant 0 : i32
    return %c0_i32, %c0_i32_0 : i32, i32
  }
  func.func @transform_4(%arg0: i32) -> (i32, i32) {
    %c0_i32 = arith.constant 0 : i32
    %c0_i32_0 = arith.constant 0 : i32
    %c0_i32_1 = arith.constant 0 : i32
    return %c0_i32, %c0_i32_0 : i32, i32
  }
  func.func @transform_5(%arg0: i32) -> (i32, i32) {
    %c0_i32 = arith.constant 0 : i32
    %c0_i32_0 = arith.constant 0 : i32
    %c0_i32_1 = arith.constant 0 : i32
    return %c0_i32, %c0_i32_0 : i32, i32
  }
  func.func @transform_6(%arg0: i32) -> (i32, i32) {
    %c0_i32 = arith.constant 0 : i32
    %c0_i32_0 = arith.constant 0 : i32
    %c0_i32_1 = arith.constant 0 : i32
    return %c0_i32, %c0_i32_0 : i32, i32
  }
  func.func @transform_7(%arg0: i32) -> (i32, i32) {
    %c0_i32 = arith.constant 0 : i32
    %c0_i32_0 = arith.constant 0 : i32
    %c0_i32_1 = arith.constant 0 : i32
    return %c0_i32, %c0_i32_0 : i32, i32
  }
  func.func @transform_8(%arg0: i32) -> (i32, i32) {
    %c0_i32 = arith.constant 0 : i32
    %c0_i32_0 = arith.constant 0 : i32
    %c0_i32_1 = arith.constant 0 : i32
    return %c0_i32, %c0_i32_0 : i32, i32
  }
}

</mosaic_0001>

<bundles_post_ra>
// kernel: tile.74
= control target key start
LH: loop header
LB: loop body
LE: loop exit
PB: predicated region body
PF: predicated region fallthrough
CT: control target
= control target key end

     0   :  { %v23_v3 = vmov 0   ;;  %s43_s0 = inlined_call_operand.vmem [shape: pred[256], index: 0, kind: input, shape index: {}]   ;;  %s44_s1 = inlined_call_operand.vmem [shape: pred[2,1,1,256], index: 1, kind: output, shape index: {}]  }
   0x1   :  { %v4_v0 = vld [vmem:[%s43_s0] ss:$0 sm:$0xff] }
   0x2   :  { %v7_v1 = vand.u32 255, %v4_v0  ;;  %v14_v2 = vshra.s32 %v4_v0, 8 }
   0x4   :  { %v8_v4 = vpack.c.b16 %v23_v3, %v7_v1  ;;  %v15_v5 = vand.u32 255, %v14_v2 }
   0x6   :  { %v9_v6 = vpack.c.b8 %v23_v3, %v8_v4  ;;  %v17_v7 = vpack.c.b16 %v23_v3, %v15_v5 }
   0x8   :  { %11 = vst [vmem:[%s44_s1] sm:$0x1] %v9_v6  ;;  %v18_v8 = vpack.c.b8 %v23_v3, %v17_v7 }
   0xa   :  { %21 = vst [vmem:[%s44_s1 + $0x1] sm:$0x1] %v18_v8 }

// kernel: resblock_forward.1
= control target key start
LH: loop header
LB: loop body
LE: loop exit
PB: predicated region body
PF: predicated region fallthrough
CT: control target
= control target key end

     0   :  { %s1039_s9 = smov 17   ;;  %vm64_vm0 = vcmask 138240   ;;  %s1040_s10 = smov 126   ;;  %v1048_v18 = vmov 0.0   ;;  %vm92_vm1 = vcmask 1039360   ;;  %vm234_vm2 = vcmask 1043456   ;;  %s1652_s0 = inlined_call_operand.vmem [shape: f32[4,512], index: 0, kind: input, shape index: {}]   ;;  %s1653_s1 = inlined_call_operand.vmem [shape: f32[36,512], index: 1, kind: input, shape index: {}]   ;;  %s1654_s2 = inlined_call_operand.vmem [shape: f32[4,36], index: 2, kind: input, shape index: {}]   ;;  %s1655_s3 = inlined_call_operand.vmem [shape: f32[4,1], index: 3, kind: input, shape index: {}]   ;;  %s1656_s4 = inlined_call_operand.vmem [shape: f32[4,1], index: 4, kind: input, shape index: {}]   ;;  %s1657_s5 = inlined_call_operand.vmem [shape: f32[4,36], index: 5, kind: input, shape index: {}]   ;;  %s1658_s6 = inlined_call_operand.vmem [shape: f32[4,1], index: 6, kind: input, shape index: {}]   ;;  %s1659_s7 = inlined_call_operand.vmem [shape: f32[4,1], index: 7, kind: input, shape index: {}]   ;;  %s1660_s8 = inlined_call_operand.vmem [shape: f32[4,512], index: 8, kind: output, shape index: {}]  }
   0x1   :  { %v29_v0 = vld [vmem:[%s1652_s0] sm:$0xff]  ;;  %v30_v1 = vld [vmem:[%s1652_s0 + $0x8] sm:$0xff]  ;;  %s1041_s11 = smov 111   ;;  %s1042_s12 = smov 96   ;;  %351 = vmatprep.mubr.f32.mxu0 %v1048_v18  ;;  %422 = vmatprep.mubr.f32.mxu1 %v1048_v18  ;;  %vm111_vm3 = vcmask 1031168   ;;  %vm130_vm4 = vcmask 916480  }
   0x2   :  { %56 = vrot.lane.b32.xlu0 %v29_v0, %s1039_s9  ;;  %60 = vrot.lane.b32.xlu1 %v30_v1, %s1039_s9  ;;  %v54_v2 = vcombine.high %v29_v0, %v29_v0  ;;  %v55_v3 = vcombine.high %v30_v1, %v30_v1  ;;  %s1043_s13 = smov 127   ;;  %s1044_s14 = smov 112   ;;  %v1211_v44 = vld [vmem:[%s1653_s1 + $0x8] sm:$0xff]  ;;  %v1225_v50 = vld [vmem:[%s1653_s1] sm:$0xff]  ;;  %vm206_vm5 = vcmask 777216   ;;  %vm187_vm6 = vcmask 785408  }
   0x3   :  { %s1045_s15 = smov 110   ;;  %s1046_s16 = smov 95   ;;  %v1218_v48 = vld [vmem:[%s1653_s1 + $0x28] sm:$0xff]  ;;  %v1230_v51 = vld [vmem:[%s1653_s1 + $0x20] sm:$0xff]  ;;  %vm168_vm7 = vcmask 900096   ;;  %vm149_vm8 = vcmask 908288  }
   0x4   :  { %s1047_s17 = smov 94   ;;  %vm225_vm9 = vcmask 769024   ;;  %vm271_vm10 = vcmask 293888  }
   0x6   :  { %58 = vrot.lane.b32.xlu0 %v54_v2, %s1039_s9  ;;  %62 = vrot.lane.b32.xlu1 %v55_v3, %s1039_s9 }
  0x74   :  { %v57_v4 = vpop.permute.xlu0 %56  ;;  %v61_v9 = vpop.permute.xlu1 %60 }
  0x75   :  { %v1106_v5 = vsel %vm64_vm0, 0.0, %v57_v4 }
  0x76   :  { %101 = vrot.lane.b32.xlu1 %v1106_v5, %s1040_s10  ;;  %v77_v8 = vrot.slane %v1106_v5, 4 }
  0x78   :  { %v59_v6 = vpop.permute.xlu0 %58  ;;  %v63_v11 = vpop.permute.xlu1 %62 }
  0x79   :  { %v1111_v7 = vsel %vm64_vm0, %v57_v4, %v59_v6  ;;  %v1122_v10 = vsel %vm64_vm0, %v59_v6, %v61_v9  ;;  %v74_v12 = vsel %vm64_vm0, %v63_v11, 0.0  ;;  %v1129_v13 = vsel %vm64_vm0, %v61_v9, %v63_v11  ;;  %v1255_v11 = vld [vmem:[%s1653_s1 + $0x18] sm:$0xff] }
  0x7a   :  { %139 = vrot.lane.b32.xlu1 %v1106_v5, %s1041_s11  ;;  %103 = vrot.lane.b32.xlu0 %v1111_v7, %s1040_s10  ;;  %v79_v14 = vrot.slane %v1122_v10, 4  ;;  %v78_v15 = vrot.slane %v1111_v7, 4  ;;  %v80_v16 = vrot.slane %v1129_v13, 4  ;;  %v81_v17 = vrot.slane %v74_v12, 4 }
  0x7e   :  { %177 = vrot.lane.b32.xlu1 %v1106_v5, %s1042_s12  ;;  %82 = vrot.lane.b32.xlu0 %v77_v8, %s1043_s13 }
  0x82   :  { %105 = vrot.lane.b32.xlu1 %v1122_v10, %s1040_s10  ;;  %120 = vrot.lane.b32.xlu0 %v77_v8, %s1044_s14 }
  0x86   :  { %107 = vrot.lane.b32.xlu1 %v1129_v13, %s1040_s10  ;;  %109 = vrot.lane.b32.xlu0 %v74_v12, %s1040_s10 }
  0x8a   :  { %141 = vrot.lane.b32.xlu1 %v1111_v7, %s1041_s11  ;;  %143 = vrot.lane.b32.xlu0 %v1122_v10, %s1041_s11 }
  0x8e   :  { %179 = vrot.lane.b32.xlu1 %v1111_v7, %s1042_s12  ;;  %181 = vrot.lane.b32.xlu0 %v1122_v10, %s1042_s12 }
  0x92   :  { %145 = vrot.lane.b32.xlu1 %v1129_v13, %s1041_s11  ;;  %158 = vrot.lane.b32.xlu0 %v77_v8, %s1045_s15 }
  0x96   :  { %183 = vrot.lane.b32.xlu1 %v1129_v13, %s1042_s12  ;;  %196 = vrot.lane.b32.xlu0 %v77_v8, %s1046_s16 }
  0x9a   :  { %217 = vrot.lane.b32.xlu1 %v1111_v7, %s1047_s17  ;;  %147 = vrot.lane.b32.xlu0 %v74_v12, %s1041_s11 }
  0x9e   :  { %86 = vrot.lane.b32.xlu1 %v79_v14, %s1043_s13  ;;  %185 = vrot.lane.b32.xlu0 %v74_v12, %s1042_s12 }
  0xa2   :  { %124 = vrot.lane.b32.xlu1 %v79_v14, %s1044_s14  ;;  %84 = vrot.lane.b32.xlu0 %v78_v15, %s1043_s13 }
  0xa6   :  { %88 = vrot.lane.b32.xlu1 %v80_v16, %s1043_s13  ;;  %122 = vrot.lane.b32.xlu0 %v78_v15, %s1044_s14 }
  0xaa   :  { %126 = vrot.lane.b32.xlu1 %v80_v16, %s1044_s14  ;;  %90 = vrot.lane.b32.xlu0 %v81_v17, %s1043_s13 }
  0xae   :  { %160 = vrot.lane.b32.xlu1 %v78_v15, %s1045_s15  ;;  %128 = vrot.lane.b32.xlu0 %v81_v17, %s1044_s14 }
  0xb2   :  { %198 = vrot.lane.b32.xlu1 %v78_v15, %s1046_s16  ;;  %162 = vrot.lane.b32.xlu0 %v79_v14, %s1045_s15 }
  0xb6   :  { %164 = vrot.lane.b32.xlu1 %v80_v16, %s1045_s15  ;;  %200 = vrot.lane.b32.xlu0 %v79_v14, %s1046_s16 }
  0xba   :  { %202 = vrot.lane.b32.xlu1 %v80_v16, %s1046_s16  ;;  %166 = vrot.lane.b32.xlu0 %v81_v17, %s1045_s15 }
  0xbe   :  { %215 = vrot.lane.b32.xlu1 %v1106_v5, %s1047_s17  ;;  %204 = vrot.lane.b32.xlu0 %v81_v17, %s1046_s16 }
  0xc2   :  { %223 = vrot.lane.b32.xlu1 %v74_v12, %s1047_s17  ;;  %219 = vrot.lane.b32.xlu0 %v1122_v10, %s1047_s17  ;;  %v1260_v12 = vld [vmem:[%s1653_s1 + $0x38] sm:$0xff] }
  0xc6   :  { %221 = vrot.lane.b32.xlu0 %v1129_v13, %s1047_s17 }
  0xe8   :  { %v102_v19 = vpop.permute.xlu1 %101 }
  0xec   :  { %v1180_v20 = vpop.permute.xlu1 %139  ;;  %v104_v21 = vpop.permute.xlu0 %103 }
  0xed   :  { %v112_v52 = vsel %vm111_vm3, %v102_v19, %v104_v21  ;;  %v1271_v19 = vld [vmem:[%s1653_s1 + $0x10] sm:$0xff] }
  0xf0   :  { %v1182_v22 = vpop.permute.xlu1 %177  ;;  %v83_v23 = vpop.permute.xlu0 %82 }
  0xf4   :  { %v106_v24 = vpop.permute.xlu1 %105  ;;  %v121_v25 = vpop.permute.xlu0 %120 }
  0xf5   :  { %v113_v53 = vsel %vm111_vm3, %v104_v21, %v106_v24 }
  0xf8   :  { %v108_v26 = vpop.permute.xlu1 %107  ;;  %v110_v27 = vpop.permute.xlu0 %109 }
  0xf9   :  { %v114_v4 = vsel %vm111_vm3, %v106_v24, %v108_v26  ;;  %v115_v15 = vsel %vm111_vm3, %v108_v26, %v110_v27 }
  0xfc   :  { %v1184_v28 = vpop.permute.xlu1 %141  ;;  %v1186_v29 = vpop.permute.xlu0 %143 }
 0x100   :  { %v1188_v30 = vpop.permute.xlu1 %179  ;;  %v1190_v31 = vpop.permute.xlu0 %181 }
 0x104   :  { %v1192_v32 = vpop.permute.xlu1 %145  ;;  %v1194_v33 = vpop.permute.xlu0 %158 }
 0x108   :  { %v1196_v34 = vpop.permute.xlu1 %183  ;;  %v1198_v35 = vpop.permute.xlu0 %196 }
 0x10c   :  { %v1200_v36 = vpop.permute.xlu1 %217  ;;  %v1202_v37 = vpop.permute.xlu0 %147 }
 0x110   :  { %v87_v38 = vpop.permute.xlu1 %86  ;;  %v1204_v39 = vpop.permute.xlu0 %185 }
 0x114   :  { %v125_v40 = vpop.permute.xlu1 %124  ;;  %v85_v41 = vpop.permute.xlu0 %84 }
 0x115   :  { %v93_v42 = vsel %vm92_vm1, %v83_v23, %v85_v41  ;;  %v94_v43 = vsel %vm92_vm1, %v85_v41, %v87_v38  ;;  %v188_v41 = vsel %vm187_vm6, %v1182_v22, %v1188_v30  ;;  %v150_v22 = vsel %vm149_vm8, %v1180_v20, %v1184_v28  ;;  %v1315_v20 = vld [vmem:[%s1653_s1 + $0x40] sm:$0xff] }
 0x116   :  { %v235_v45 = vsel %vm234_vm2, %v1106_v5, %v93_v42  ;;  %v236_v49 = vsel %vm234_vm2, %v1111_v7, %v94_v43  ;;  %v1250_v7 = vld [vmem:[%s1653_s1 + $0x30] sm:$0xff] }
 0x117   :  { %v252_v58 = vmul.f32 %v236_v49, %v1211_v44  ;;  %v251_v60 = vmul.f32 %v235_v45, %v1225_v50  ;;  %v151_v45 = vsel %vm149_vm8, %v1184_v28, %v1186_v29 }
 0x118   :  { %v89_v46 = vpop.permute.xlu1 %88  ;;  %v123_v47 = vpop.permute.xlu0 %122 }
 0x119   :  { %v131_v54 = vsel %vm130_vm4, %v121_v25, %v123_v47  ;;  %v132_v55 = vsel %vm130_vm4, %v123_v47, %v125_v40  ;;  %v95_v5 = vsel %vm92_vm1, %v87_v38, %v89_v46 }
 0x11a   :  { %v239_v56 = vsel %vm234_vm2, %v112_v52, %v131_v54  ;;  %v240_v57 = vsel %vm234_vm2, %v113_v53, %v132_v55  ;;  %v237_v16 = vsel %vm234_vm2, %v1122_v10, %v95_v5  ;;  %v1307_v52 = vld [vmem:[%s1653_s1 + $0x68] sm:$0xff]  ;;  %v189_v54 = vsel %vm187_vm6, %v1188_v30, %v1190_v31  ;;  %v1336_v5 = vld [vmem:[%s1653_s1 + $0x70] sm:$0xff] }
 0x11b   :  { %v256_v59 = vmul.f32 %v240_v57, %v1218_v48  ;;  %v255_v61 = vmul.f32 %v239_v56, %v1230_v51  ;;  %v253_v26 = vmul.f32 %v237_v16, %v1271_v19 }
 0x11c   :  { %v127_v62 = vpop.permute.xlu1 %126  ;;  %v91_v63 = vpop.permute.xlu0 %90 }
 0x11d   :  { %v133_v0 = vsel %vm130_vm4, %v125_v40, %v127_v62  ;;  %v96_v1 = vsel %vm92_vm1, %v89_v46, %v91_v63  ;;  %v970_v2 = vpack.c.bf16 %v256_v59, %v252_v58  ;;  %v972_v3 = vpack.c.bf16 %v255_v61, %v251_v60  ;;  %v1292_v46 = vld [vmem:[%s1653_s1 + $0x60] sm:$0xff] }
 0x11e   :  { %v241_v6 = vsel %vm234_vm2, %v114_v4, %v133_v0  ;;  %v238_v14 = vsel %vm234_vm2, %v1129_v13, %v96_v1  ;;  %v190_v1 = vsel %vm187_vm6, %v1190_v31, %v1196_v34  ;;  %v153_v4 = vsel %vm149_vm8, %v1192_v32, %v1202_v37  ;;  %v1345_v31 = vld [vmem:[%s1653_s1 + $0x58] sm:$0xff] }
 0x11f   :  { %971 = vmatprep.subr.bf16.mxu0 %v970_v2  ;;  %v257_v23 = vmul.f32 %v241_v6, %v1250_v7  ;;  %v254_v13 = vmul.f32 %v238_v14, %v1255_v11  ;;  %v1351_v37 = vld [vmem:[%s1653_s1 + $0x78] sm:$0xff] }
 0x120   :  { %v161_v8 = vpop.permute.xlu1 %160  ;;  %973 = vmatpush1.bf16.msra.mxu0 %v972_v3  ;;  %v129_v9 = vpop.permute.xlu0 %128 }
 0x121   :  { %v134_v17 = vsel %vm130_vm4, %v127_v62, %v129_v9  ;;  %v169_v42 = vsel %vm168_vm7, %v1194_v33, %v161_v8  ;;  %v980_v43 = vpack.c.bf16 %v257_v23, %v253_v26  ;;  %v1301_v33 = vld [vmem:[%s1653_s1 + $0x48] sm:$0xff] }
 0x122   :  { %v242_v21 = vsel %vm234_vm2, %v115_v15, %v134_v17  ;;  %v243_v28 = vsel %vm234_vm2, %v150_v22, %v169_v42  ;;  %v191_v15 = vsel %vm187_vm6, %v1196_v34, %v1204_v39  ;;  %v1370_v34 = vld [vmem:[%s1653_s1 + $0x88] sm:$0xf]  ;;  %v1386_v42 = vld [vmem:[%s1653_s1 + $0x90] sm:$0xf] }
 0x123   :  { %v258_v24 = vmul.f32 %v242_v21, %v1260_v12  ;;  %v259_v60 = vmul.f32 %v243_v28, %v1315_v20 }
 0x124   :  { %v199_v10 = vpop.permute.xlu1 %198  ;;  %v163_v25 = vpop.permute.xlu0 %162 }
 0x125   :  { %v207_v27 = vsel %vm206_vm5, %v1198_v35, %v199_v10  ;;  %v170_v38 = vsel %vm168_vm7, %v161_v8, %v163_v25  ;;  %v978_v40 = vpack.c.bf16 %v258_v24, %v254_v13  ;;  %v152_v8 = vsel %vm149_vm8, %v1186_v29, %v1192_v32  ;;  %v1359_v29 = vld [vmem:[%s1653_s1 + $0x50] sm:$0xff] }
 0x126   :  { %v247_v35 = vsel %vm234_vm2, %v188_v41, %v207_v27  ;;  %v244_v47 = vsel %vm234_vm2, %v151_v45, %v170_v38  ;;  %v1392_v45 = vld [vmem:[%s1653_s1 + $0x98] sm:$0xf] }
 0x127   :  { %979 = vmatprep.subr.bf16.mxu1 %v978_v40  ;;  %v263_v56 = vmul.f32 %v247_v35, %v1292_v46  ;;  %v260_v58 = vmul.f32 %v244_v47, %v1301_v33 }
 0x128   :  { %v165_v49 = vpop.permute.xlu1 %164  ;;  %981 = vmatpush1.bf16.msra.mxu1 %v980_v43  ;;  %v201_v53 = vpop.permute.xlu0 %200 }
 0x129   :  { %v208_v55 = vsel %vm206_vm5, %v199_v10, %v201_v53  ;;  %v171_v2 = vsel %vm168_vm7, %v163_v25, %v165_v49  ;;  %v976_v3 = vpack.c.bf16 %v263_v56, %v259_v60  ;;  %v1376_v10 = vld [vmem:[%s1653_s1 + $0x80] sm:$0xf] }
 0x12a   :  { %v248_v57 = vsel %vm234_vm2, %v189_v54, %v208_v55  ;;  %v245_v32 = vsel %vm234_vm2, %v152_v8, %v171_v2 }
 0x12b   :  { %v264_v59 = vmul.f32 %v248_v57, %v1307_v52  ;;  %v261_v39 = vmul.f32 %v245_v32, %v1359_v29  ;;  %v1049_v32 = vmov 0  }
 0x12c   :  { %v203_v30 = vpop.permute.xlu1 %202  ;;  %v167_v61 = vpop.permute.xlu0 %166  ;;  %1013 = vset.pattern.permute.xlu0 %v1049_v32  ;;  %1014 = vset.pattern.permute.xlu1 %v1049_v32 }
 0x12d   :  { %v209_v62 = vsel %vm206_vm5, %v201_v53, %v203_v30  ;;  %v172_v63 = vsel %vm168_vm7, %v165_v49, %v167_v61  ;;  %v974_v0 = vpack.c.bf16 %v264_v59, %v260_v58 }
 0x12e   :  { %v249_v6 = vsel %vm234_vm2, %v190_v1, %v209_v62  ;;  %v246_v9 = vsel %vm234_vm2, %v153_v4, %v172_v63 }
 0x12f   :  { %975 = vmatprep.subr.bf16.mxu0 %v974_v0  ;;  %v265_v21 = vmul.f32 %v249_v6, %v1336_v5  ;;  %v262_v13 = vmul.f32 %v246_v9, %v1345_v31 }
 0x130   :  { %977 = vmatpush1.bf16.msra.mxu0 %v976_v3  ;;  %v205_v14 = vpop.permute.xlu0 %204  ;;  %v216_v16 = vpop.permute.xlu1 %215 }
 0x131   :  { %v210_v17 = vsel %vm206_vm5, %v203_v30, %v205_v14  ;;  %v226_v25 = vsel %vm225_vm9, %v216_v16, %v1200_v36  ;;  %v984_v41 = vpack.c.bf16 %v265_v21, %v261_v39 }
 0x132   :  { %v250_v23 = vsel %vm234_vm2, %v191_v15, %v210_v17  ;;  %v267_v43 = vmul.f32 %v226_v25, %v1376_v10  ;;  %v429_v25 = vld [vmem:[%s1655_s3] sm:$0xf] }
 0x133   :  { %v266_v24 = vmul.f32 %v250_v23, %v1351_v37 }
 0x134   :  { %v220_v26 = vpop.permute.xlu0 %219  ;;  %v224_v35 = vpop.permute.xlu1 %223 }
 0x135   :  { %v227_v27 = vsel %vm225_vm9, %v1200_v36, %v220_v26  ;;  %v982_v38 = vpack.c.bf16 %v266_v24, %v262_v13  ;;  %v51_v36 = vld [vmem:[%s1654_s2] sm:$0xf] }
 0x136   :  { %v268_v40 = vmul.f32 %v227_v27, %v1370_v34 }
 0x137   :  { %983 = vmatprep.subr.bf16.mxu1 %v982_v38  ;;  %v430_v38 = vld [vmem:[%s1656_s4] sm:$0xf] }
 0x138   :  { %958 = vmatprep.subr.msk.mxu0 %vm234_vm2, %v268_v40  ;;  %985 = vmatpush1.bf16.msra.mxu1 %v984_v41  ;;  %v222_v22 = vpop.permute.xlu0 %221 }
 0x139   :  { %v228_v47 = vsel %vm225_vm9, %v220_v26, %v222_v22  ;;  %v229_v49 = vsel %vm225_vm9, %v222_v22, %v224_v35  ;;  %959 = vmatpush1.msk.msra.mxu0 %vm234_vm2, %v267_v43 }
 0x13a   :  { %v269_v53 = vmul.f32 %v228_v47, %v1386_v42  ;;  %v270_v54 = vmul.f32 %v229_v49, %v1392_v45  ;;  %960 = vmatmul.mubr.msk.f32.vlgmr.msra.gmra.mrb[0].mxu0 %vm271_vm10, %v51_v36 }
 0x13b   :  { %813 = vmatprep.mubr.f32.mxu0 %v1048_v18 }
 0x13c   :  { %961 = vmatprep.subr.msk.mxu1 %vm234_vm2, %v270_v54 }
 0x13d   :  { %962 = vmatpush1.msk.msra.mxu1 %vm234_vm2, %v269_v53 }
 0x13e   :  { %963 = vmatmul.mubr.msk.f32.vlgmr.msra.gmra.mrb[0].mxu1 %vm271_vm10, %v51_v36 }
 0x13f   :  { %884 = vmatprep.mubr.f32.mxu1 %v1048_v18 }
 0x20d   :  { %v353_v28 = vpop.f32.mrb[0].mxu0 }
 0x20e   :  { %v431_v55 = vsel %vm234_vm2, %v353_v28, 0.0  ;;  %v441_v56 = vmul.f32 %v353_v28, %v353_v28  ;;  %v355_v57 = vpop.f32.mrb[1].mxu0 }
 0x20f   :  { %v432_v58 = vsel %vm234_vm2, %v355_v57, 0.0  ;;  %v442_v59 = vmul.f32 %v355_v57, %v355_v57 }
 0x210   :  { %v445_v60 = vsel %vm234_vm2, %v441_v56, 0.0  ;;  %v433_v30 = vadd.f32 %v432_v58, %v431_v55 }
 0x211   :  { %v446_v61 = vsel %vm234_vm2, %v442_v59, 0.0  ;;  %v424_v62 = vpop.f32.mrb[0].mxu1 }
 0x212   :  { %v434_v63 = vsel %vm234_vm2, %v424_v62, 0.0  ;;  %v443_v0 = vmul.f32 %v424_v62, %v424_v62  ;;  %v426_v1 = vpop.f32.mrb[1].mxu1  ;;  %v447_v2 = vadd.f32 %v446_v61, %v445_v60 }
 0x213   :  { %v444_v18 = vmul.f32 %v426_v1, %v426_v1  ;;  %v435_v3 = vadd.f32 %v434_v63, %v433_v30  ;;  %v436_v4 = vsel %vm234_vm2, %v426_v1, 0.0 }
 0x214   :  { %v448_v6 = vsel %vm234_vm2, %v443_v0, 0.0 }
 0x215   :  { %v437_v8 = vadd.f32 %v436_v4, %v435_v3  ;;  %v449_v9 = vadd.f32 %v448_v6, %v447_v2  ;;  %v450_v14 = vsel %vm234_vm2, %v444_v18, 0.0 }
 0x217   :  { %438 = vadd.xlane.f32.xlu0 %v437_v8  ;;  %v451_v15 = vadd.f32 %v450_v14, %v449_v9 }
 0x219   :  { %452 = vadd.xlane.f32.xlu1 %v451_v15 }
 0x2a4   :  { %v439_v16 = vpop.xlane.xlu0 %438 }
 0x2a5   :  { %v440_v17 = vmul.f32 0.001953125, %v439_v16 }
 0x2a6   :  { %v453_v21 = vpop.xlane.xlu1 %452 }
 0x2a7   :  { %v455_v23 = vmul.f32 %v440_v17, %v440_v17  ;;  %v454_v13 = vmul.f32 0.001953125, %v453_v21 }
 0x2a9   :  { %v456_v24 = vsub.f32 %v454_v13, %v455_v23 }
 0x2ab   :  { %v457_v39 = vadd.f32 1e-05, %v456_v24 }
 0x2ad   :  { %1017 = vrsqrt.f32 %v457_v39 }
 0x2b7   :  { %v1018_v26 = vpop.eup %1017 }
 0x2b8   :  { %v459_v27 = vmul.f32 %v1018_v26, %v429_v25 }
 0x2ba   :  { %464 = vperm.xlu0 %1013, %v459_v27   ;;  %v460_v40 = vmul.f32 %v459_v27, %v440_v17 }
 0x2bc   :  { %v461_v41 = vsub.f32 %v430_v38, %v460_v40 }
 0x2be   :  { %473 = vperm.xlu1 %1014, %v461_v41  }
 0x339   :  { %v465_v43 = vpop.permute.xlu0 %464 }
 0x33a   :  { %v467_v36 = vmul.f32 %v465_v43, %v353_v28  ;;  %v468_v35 = vmul.f32 %v465_v43, %v355_v57  ;;  %v469_v22 = vmul.f32 %v465_v43, %v424_v62  ;;  %v470_v47 = vmul.f32 %v465_v43, %v426_v1 }
 0x33d   :  { %v474_v49 = vpop.permute.xlu1 %473 }
 0x33e   :  { %v476_v53 = vadd.f32 %v474_v49, %v467_v36  ;;  %v477_v54 = vadd.f32 %v474_v49, %v468_v35  ;;  %v478_v55 = vadd.f32 %v474_v49, %v469_v22  ;;  %v479_v56 = vadd.f32 %v474_v49, %v470_v47 }
 0x340   :  { %v480_v58 = vmin.f32 %v476_v53, 20.0  ;;  %v481_v59 = vmin.f32 %v477_v54, 20.0  ;;  %v482_v60 = vmin.f32 %v478_v55, 20.0  ;;  %v483_v30 = vmin.f32 %v479_v56, 20.0 }
 0x341   :  { %vm512_vm11 = vcmp.gt.f32.partialorder %v476_v53, 20.0  ;;  %vm513_vm12 = vcmp.gt.f32.partialorder %v477_v54, 20.0  ;;  %vm514_vm13 = vcmp.gt.f32.partialorder %v478_v55, 20.0  ;;  %vm515_vm14 = vcmp.gt.f32.partialorder %v479_v56, 20.0 }
 0x342   :  { %v484_v61 = vmul.f32 1.442695, %v480_v58  ;;  %v486_v63 = vmul.f32 1.442695, %v481_v59  ;;  %v488_v0 = vmul.f32 1.442695, %v482_v60 }
 0x343   :  { %v490_v2 = vmul.f32 1.442695, %v483_v30 }
 0x344   :  { %1019 = vpow2.f32 %v484_v61 }
 0x345   :  { %1021 = vpow2.f32 %v486_v63 }
 0x346   :  { %1023 = vpow2.f32 %v488_v0 }
 0x347   :  { %1025 = vpow2.f32 %v490_v2 }
 0x34e   :  { %v1020_v28 = vpop.eup %1019 }
 0x34f   :  { %v1022_v57 = vpop.eup %1021  ;;  %v492_v62 = vadd.f32 2.0, %v1020_v28 }
 0x350   :  { %v1024_v1 = vpop.eup %1023  ;;  %v493_v18 = vadd.f32 2.0, %v1022_v57 }
 0x351   :  { %v1026_v3 = vpop.eup %1025  ;;  %v496_v4 = vmul.f32 %v1020_v28, %v492_v62  ;;  %v494_v6 = vadd.f32 2.0, %v1024_v1 }
 0x352   :  { %v497_v8 = vmul.f32 %v1022_v57, %v493_v18  ;;  %v495_v9 = vadd.f32 2.0, %v1026_v3 }
 0x353   :  { %v500_v14 = vadd.f32 2.0, %v496_v4  ;;  %v498_v15 = vmul.f32 %v1024_v1, %v494_v6 }
 0x354   :  { %v501_v32 = vadd.f32 2.0, %v497_v8  ;;  %v499_v16 = vmul.f32 %v1026_v3, %v495_v9 }
 0x355   :  { %1027 = vrcp.f32 %v500_v14  ;;  %v502_v17 = vadd.f32 2.0, %v498_v15 }
 0x356   :  { %1029 = vrcp.f32 %v501_v32  ;;  %v503_v21 = vadd.f32 2.0, %v499_v16 }
 0x357   :  { %1031 = vrcp.f32 %v502_v17 }
 0x358   :  { %1033 = vrcp.f32 %v503_v21 }
 0x35f   :  { %v1028_v23 = vpop.eup %1027 }
 0x360   :  { %v1030_v13 = vpop.eup %1029  ;;  %v508_v24 = vmul.f32 %v1028_v23, %v496_v4 }
 0x361   :  { %v1032_v39 = vpop.eup %1031  ;;  %v509_v25 = vmul.f32 %v1030_v13, %v497_v8 }
 0x362   :  { %v516_v26 = vsel %vm512_vm11, 1.0, %v508_v24  ;;  %v510_v40 = vmul.f32 %v1032_v39, %v498_v15  ;;  %v1034_v41 = vpop.eup %1033 }
 0x363   :  { %v520_v27 = vmul.f32 %v516_v26, %v476_v53  ;;  %v517_v38 = vsel %vm513_vm12, 1.0, %v509_v25  ;;  %v511_v35 = vmul.f32 %v1034_v41, %v499_v16 }
 0x364   :  { %v521_v43 = vmul.f32 %v517_v38, %v477_v54  ;;  %v518_v36 = vsel %vm514_vm13, 1.0, %v510_v40 }
 0x365   :  { %529 = vrot.lane.b32.xlu1 %v520_v27, %s1039_s9  ;;  %v522_v22 = vmul.f32 %v518_v36, %v478_v55  ;;  %v519_v47 = vsel %vm515_vm14, 1.0, %v511_v35 }
 0x366   :  { %v523_v49 = vmul.f32 %v519_v47, %v479_v56 }
 0x369   :  { %531 = vrot.lane.b32.xlu1 %v521_v43, %s1039_s9 }
 0x36d   :  { %533 = vrot.lane.b32.xlu1 %v522_v22, %s1039_s9 }
 0x371   :  { %535 = vrot.lane.b32.xlu1 %v523_v49, %s1039_s9 }
 0x3d7   :  { %v530_v53 = vpop.permute.xlu1 %529 }
 0x3d8   :  { %v1438_v56 = vsel %vm64_vm0, 0.0, %v530_v53 }
 0x3d9   :  { %v549_v0 = vrot.slane %v1438_v56, 4 }
 0x3db   :  { %v532_v58 = vpop.permute.xlu1 %531 }
 0x3dc   :  { %v1428_v59 = vsel %vm64_vm0, %v530_v53, %v532_v58 }
 0x3dd   :  { %574 = vrot.lane.b32.xlu0 %v1428_v59, %s1040_s10  ;;  %v550_v63 = vrot.slane %v1428_v59, 4 }
 0x3df   :  { %v534_v54 = vpop.permute.xlu1 %533 }
 0x3e0   :  { %v1433_v60 = vsel %vm64_vm0, %v532_v58, %v534_v54 }
 0x3e1   :  { %576 = vrot.lane.b32.xlu1 %v1433_v60, %s1040_s10  ;;  %v551_v28 = vrot.slane %v1433_v60, 4 }
 0x3e3   :  { %v536_v55 = vpop.permute.xlu1 %535 }
 0x3e4   :  { %v546_v30 = vsel %vm64_vm0, %v536_v55, 0.0  ;;  %v1445_v61 = vsel %vm64_vm0, %v534_v54, %v536_v55 }
 0x3e5   :  { %572 = vrot.lane.b32.xlu1 %v1438_v56, %s1040_s10  ;;  %580 = vrot.lane.b32.xlu0 %v546_v30, %s1040_s10  ;;  %v553_v2 = vrot.slane %v546_v30, 4  ;;  %v552_v57 = vrot.slane %v1445_v61, 4 }
 0x3e9   :  { %612 = vrot.lane.b32.xlu0 %v1433_v60, %s1041_s11  ;;  %578 = vrot.lane.b32.xlu1 %v1445_v61, %s1040_s10 }
 0x3ed   :  { %648 = vrot.lane.b32.xlu0 %v1433_v60, %s1042_s12  ;;  %610 = vrot.lane.b32.xlu1 %v1428_v59, %s1041_s11 }
 0x3f1   :  { %616 = vrot.lane.b32.xlu0 %v546_v30, %s1041_s11  ;;  %646 = vrot.lane.b32.xlu1 %v1428_v59, %s1042_s12 }
 0x3f5   :  { %652 = vrot.lane.b32.xlu0 %v546_v30, %s1042_s12  ;;  %608 = vrot.lane.b32.xlu1 %v1438_v56, %s1041_s11 }
 0x3f9   :  { %592 = vrot.lane.b32.xlu0 %v550_v63, %s1044_s14  ;;  %644 = vrot.lane.b32.xlu1 %v1438_v56, %s1042_s12 }
 0x3fd   :  { %554 = vrot.lane.b32.xlu0 %v549_v0, %s1043_s13  ;;  %614 = vrot.lane.b32.xlu1 %v1445_v61, %s1041_s11 }
 0x401   :  { %590 = vrot.lane.b32.xlu0 %v549_v0, %s1044_s14  ;;  %650 = vrot.lane.b32.xlu1 %v1445_v61, %s1042_s12 }
 0x405   :  { %562 = vrot.lane.b32.xlu0 %v553_v2, %s1043_s13  ;;  %682 = vrot.lane.b32.xlu1 %v1428_v59, %s1047_s17 }
 0x409   :  { %598 = vrot.lane.b32.xlu0 %v553_v2, %s1044_s14  ;;  %556 = vrot.lane.b32.xlu1 %v550_v63, %s1043_s13 }
 0x40d   :  { %630 = vrot.lane.b32.xlu0 %v551_v28, %s1045_s15  ;;  %558 = vrot.lane.b32.xlu1 %v551_v28, %s1043_s13 }
 0x411   :  { %666 = vrot.lane.b32.xlu0 %v551_v28, %s1046_s16  ;;  %594 = vrot.lane.b32.xlu1 %v551_v28, %s1044_s14 }
 0x415   :  { %626 = vrot.lane.b32.xlu0 %v549_v0, %s1045_s15  ;;  %560 = vrot.lane.b32.xlu1 %v552_v57, %s1043_s13 }
 0x419   :  { %662 = vrot.lane.b32.xlu0 %v549_v0, %s1046_s16  ;;  %596 = vrot.lane.b32.xlu1 %v552_v57, %s1044_s14 }
 0x41d   :  { %634 = vrot.lane.b32.xlu0 %v553_v2, %s1045_s15  ;;  %628 = vrot.lane.b32.xlu1 %v550_v63, %s1045_s15 }
 0x421   :  { %670 = vrot.lane.b32.xlu0 %v553_v2, %s1046_s16  ;;  %664 = vrot.lane.b32.xlu1 %v550_v63, %s1046_s16 }
 0x425   :  { %684 = vrot.lane.b32.xlu0 %v1433_v60, %s1047_s17  ;;  %632 = vrot.lane.b32.xlu1 %v552_v57, %s1045_s15 }
 0x429   :  { %686 = vrot.lane.b32.xlu0 %v1445_v61, %s1047_s17  ;;  %668 = vrot.lane.b32.xlu1 %v552_v57, %s1046_s16 }
 0x42d   :  { %680 = vrot.lane.b32.xlu1 %v1438_v56, %s1047_s17 }
 0x431   :  { %688 = vrot.lane.b32.xlu1 %v546_v30, %s1047_s17 }
 0x44f   :  { %v575_v62 = vpop.permute.xlu0 %574 }
 0x453   :  { %v577_v1 = vpop.permute.xlu1 %576 }
 0x454   :  { %v583_v54 = vsel %vm111_vm3, %v575_v62, %v577_v1 }
 0x457   :  { %v581_v18 = vpop.permute.xlu0 %580  ;;  %v573_v3 = vpop.permute.xlu1 %572 }
 0x458   :  { %v582_v47 = vsel %vm111_vm3, %v573_v3, %v575_v62 }
 0x45b   :  { %v1500_v4 = vpop.permute.xlu0 %612  ;;  %v579_v6 = vpop.permute.xlu1 %578 }
 0x45f   :  { %v1502_v8 = vpop.permute.xlu0 %648  ;;  %v1504_v9 = vpop.permute.xlu1 %610 }
 0x463   :  { %v1506_v14 = vpop.permute.xlu0 %616  ;;  %v1508_v15 = vpop.permute.xlu1 %646 }
 0x467   :  { %v1510_v32 = vpop.permute.xlu0 %652  ;;  %v609_v16 = vpop.permute.xlu1 %608 }
 0x46b   :  { %v593_v17 = vpop.permute.xlu0 %592  ;;  %v1512_v21 = vpop.permute.xlu1 %644 }
 0x46f   :  { %v555_v23 = vpop.permute.xlu0 %554  ;;  %v1514_v13 = vpop.permute.xlu1 %614 }
 0x473   :  { %v591_v24 = vpop.permute.xlu0 %590  ;;  %v1516_v39 = vpop.permute.xlu1 %650 }
 0x474   :  { %v600_v35 = vsel %vm130_vm4, %v591_v24, %v593_v17 }
 0x475   :  { %v702_v55 = vsel %vm234_vm2, %v582_v47, %v600_v35 }
 0x476   :  { %v718_v28 = vmul.f32 %v702_v55, %v1230_v51  ;;  %v584_v51 = vsel %vm111_vm3, %v577_v1, %v579_v6  ;;  %v654_v55 = vsel %vm187_vm6, %v1512_v21, %v1508_v15 }
 0x477   :  { %v563_v25 = vpop.permute.xlu0 %562  ;;  %v1518_v26 = vpop.permute.xlu1 %682 }
 0x47b   :  { %v599_v27 = vpop.permute.xlu0 %598  ;;  %v557_v38 = vpop.permute.xlu1 %556 }
 0x47c   :  { %v564_v40 = vsel %vm92_vm1, %v555_v23, %v557_v38 }
 0x47d   :  { %v698_v22 = vsel %vm234_vm2, %v1438_v56, %v564_v40 }
 0x47e   :  { %v714_v63 = vmul.f32 %v698_v22, %v1225_v50 }
 0x47f   :  { %v1521_v41 = vpop.permute.xlu0 %630  ;;  %v559_v43 = vpop.permute.xlu1 %558 }
 0x480   :  { %v565_v36 = vsel %vm92_vm1, %v557_v38, %v559_v43  ;;  %v988_v24 = vpack.c.bf16 %v718_v28, %v714_v63  ;;  %v585_v38 = vsel %vm111_vm3, %v579_v6, %v581_v18 }
 0x481   :  { %v699_v49 = vsel %vm234_vm2, %v1428_v59, %v565_v36 }
 0x482   :  { %v715_v56 = vmul.f32 %v699_v49, %v1211_v44 }
 0x483   :  { %v1530_v53 = vpop.permute.xlu0 %666  ;;  %v595_v58 = vpop.permute.xlu1 %594 }
 0x484   :  { %v601_v30 = vsel %vm130_vm4, %v593_v17, %v595_v58 }
 0x485   :  { %v703_v0 = vsel %vm234_vm2, %v583_v54, %v601_v30 }
 0x486   :  { %v719_v2 = vmul.f32 %v703_v0, %v1218_v48 }
 0x487   :  { %v627_v59 = vpop.permute.xlu0 %626  ;;  %v561_v57 = vpop.permute.xlu1 %560 }
 0x488   :  { %v566_v3 = vsel %vm92_vm1, %v559_v43, %v561_v57  ;;  %v567_v62 = vsel %vm92_vm1, %v561_v57, %v563_v25  ;;  %v986_v23 = vpack.c.bf16 %v719_v2, %v715_v56 }
 0x489   :  { %v700_v50 = vsel %vm234_vm2, %v1433_v60, %v566_v3  ;;  %v701_v17 = vsel %vm234_vm2, %v1445_v61, %v567_v62 }
 0x48a   :  { %987 = vmatprep.subr.bf16.mxu0 %v986_v23  ;;  %v716_v60 = vmul.f32 %v700_v50, %v1271_v19  ;;  %v717_v35 = vmul.f32 %v701_v17, %v1255_v11  ;;  %v619_v11 = vsel %vm149_vm8, %v1504_v9, %v1500_v4 }
 0x48b   :  { %v663_v44 = vpop.permute.xlu0 %662  ;;  %989 = vmatpush1.bf16.msra.mxu0 %v988_v24  ;;  %v597_v48 = vpop.permute.xlu1 %596 }
 0x48c   :  { %v602_v40 = vsel %vm130_vm4, %v595_v58, %v597_v48  ;;  %v603_v25 = vsel %vm130_vm4, %v597_v48, %v599_v27  ;;  %v618_v58 = vsel %vm149_vm8, %v609_v16, %v1504_v9 }
 0x48d   :  { %v704_v43 = vsel %vm234_vm2, %v584_v51, %v602_v40  ;;  %v705_v36 = vsel %vm234_vm2, %v585_v38, %v603_v25 }
 0x48e   :  { %v720_v61 = vmul.f32 %v704_v43, %v1250_v7  ;;  %v721_v22 = vmul.f32 %v705_v36, %v1260_v12  ;;  %v655_v7 = vsel %vm187_vm6, %v1508_v15, %v1502_v8  ;;  %v524_v36 = vld [vmem:[%s1657_s5] sm:$0xf] }
 0x48f   :  { %v635_v47 = vpop.permute.xlu0 %634  ;;  %v629_v1 = vpop.permute.xlu1 %628 }
 0x490   :  { %v996_v49 = vpack.c.bf16 %v720_v61, %v716_v60  ;;  %v636_v18 = vsel %vm168_vm7, %v627_v59, %v629_v1  ;;  %v994_v6 = vpack.c.bf16 %v721_v22, %v717_v35  ;;  %v637_v27 = vsel %vm168_vm7, %v629_v1, %v1521_v41 }
 0x491   :  { %v706_v12 = vsel %vm234_vm2, %v618_v58, %v636_v18  ;;  %v707_v16 = vsel %vm234_vm2, %v619_v11, %v637_v27 }
 0x492   :  { %995 = vmatprep.subr.bf16.mxu1 %v994_v6  ;;  %v722_v56 = vmul.f32 %v706_v12, %v1315_v20  ;;  %v723_v59 = vmul.f32 %v707_v16, %v1301_v33  ;;  %v621_v33 = vsel %vm149_vm8, %v1514_v13, %v1506_v14 }
 0x493   :  { %v671_v19 = vpop.permute.xlu0 %670  ;;  %997 = vmatpush1.bf16.msra.mxu1 %v996_v49  ;;  %v665_v54 = vpop.permute.xlu1 %664 }
 0x494   :  { %v672_v30 = vsel %vm206_vm5, %v663_v44, %v665_v54  ;;  %v673_v9 = vsel %vm206_vm5, %v665_v54, %v1530_v53 }
 0x495   :  { %v710_v63 = vsel %vm234_vm2, %v654_v55, %v672_v30  ;;  %v711_v0 = vsel %vm234_vm2, %v655_v7, %v673_v9 }
 0x496   :  { %v726_v2 = vmul.f32 %v710_v63, %v1292_v46  ;;  %v727_v28 = vmul.f32 %v711_v0, %v1307_v52  ;;  %v620_v46 = vsel %vm149_vm8, %v1500_v4, %v1514_v13 }
 0x497   :  { %v685_v15 = vpop.permute.xlu0 %684  ;;  %v633_v21 = vpop.permute.xlu1 %632 }
 0x498   :  { %v992_v57 = vpack.c.bf16 %v726_v2, %v722_v56  ;;  %v691_v3 = vsel %vm225_vm9, %v1518_v26, %v685_v15  ;;  %v638_v62 = vsel %vm168_vm7, %v1521_v41, %v633_v21  ;;  %v639_v23 = vsel %vm168_vm7, %v633_v21, %v635_v47 }
 0x499   :  { %v731_v24 = vmul.f32 %v691_v3, %v1370_v34  ;;  %v990_v20 = vpack.c.bf16 %v727_v28, %v723_v59  ;;  %v708_v52 = vsel %vm234_vm2, %v620_v46, %v638_v62  ;;  %v709_v50 = vsel %vm234_vm2, %v621_v33, %v639_v23  ;;  %v892_v3 = vld [vmem:[%s1659_s7] sm:$0xf] }
 0x49a   :  { %v656_v41 = vsel %vm187_vm6, %v1502_v8, %v1516_v39  ;;  %v657_v34 = vsel %vm187_vm6, %v1516_v39, %v1510_v32  ;;  %v724_v48 = vmul.f32 %v708_v52, %v1359_v29  ;;  %v725_v8 = vmul.f32 %v709_v50, %v1345_v31 }
 0x49b   :  { %991 = vmatprep.subr.bf16.mxu0 %v990_v20  ;;  %v669_v17 = vpop.permute.xlu1 %668  ;;  %v687_v38 = vpop.permute.xlu0 %686 }
 0x49c   :  { %993 = vmatpush1.bf16.msra.mxu0 %v992_v57  ;;  %v674_v4 = vsel %vm206_vm5, %v1530_v53, %v669_v17  ;;  %v675_v14 = vsel %vm206_vm5, %v669_v17, %v671_v19  ;;  %v692_v31 = vsel %vm225_vm9, %v685_v15, %v687_v38  ;;  %v891_v15 = vld [vmem:[%s1658_s6] sm:$0xf] }
 0x49d   :  { %v712_v13 = vsel %vm234_vm2, %v656_v41, %v674_v4  ;;  %v713_v44 = vsel %vm234_vm2, %v657_v34, %v675_v14  ;;  %964 = vmatprep.subr.msk.mxu0 %vm234_vm2, %v731_v24 }
 0x49e   :  { %v728_v51 = vmul.f32 %v712_v13, %v1336_v5  ;;  %v729_v32 = vmul.f32 %v713_v44, %v1351_v37  ;;  %v1037_v44 = vld [vmem:[%s1652_s0] sm:$0xff] }
 0x49f   :  { %v681_v39 = vpop.permute.xlu1 %680 }
 0x4a0   :  { %v1000_v40 = vpack.c.bf16 %v728_v51, %v724_v48  ;;  %v690_v53 = vsel %vm225_vm9, %v681_v39, %v1518_v26  ;;  %v998_v25 = vpack.c.bf16 %v729_v32, %v725_v8  ;;  %v732_v26 = vmul.f32 %v692_v31, %v1386_v42  ;;  %v1038_v8 = vld [vmem:[%s1652_s0 + $0x8] sm:$0xff] }
 0x4a1   :  { %v730_v43 = vmul.f32 %v690_v53, %v1376_v10 }
 0x4a2   :  { %999 = vmatprep.subr.bf16.mxu1 %v998_v25 }
 0x4a3   :  { %965 = vmatpush1.msk.msra.mxu0 %vm234_vm2, %v730_v43  ;;  %1001 = vmatpush1.bf16.msra.mxu1 %v1000_v40  ;;  %v689_v5 = vpop.permute.xlu1 %688 }
 0x4a4   :  { %v693_v37 = vsel %vm225_vm9, %v687_v38, %v689_v5  ;;  %966 = vmatmul.mubr.msk.f32.vlgmr.msra.gmra.mrb[2].mxu0 %vm271_vm10, %v524_v36 }
 0x4a5   :  { %v733_v29 = vmul.f32 %v693_v37, %v1392_v45 }
 0x4a7   :  { %967 = vmatprep.subr.msk.mxu1 %vm234_vm2, %v733_v29 }
 0x4a8   :  { %968 = vmatpush1.msk.msra.mxu1 %vm234_vm2, %v732_v26 }
 0x4a9   :  { %969 = vmatmul.mubr.msk.f32.vlgmr.msra.gmra.mrb[2].mxu1 %vm271_vm10, %v524_v36 }
 0x577   :  { %v815_v10 = vpop.f32.mrb[2].mxu0 }
 0x578   :  { %v893_v60 = vsel %vm234_vm2, %v815_v10, 0.0  ;;  %v903_v35 = vmul.f32 %v815_v10, %v815_v10  ;;  %v817_v61 = vpop.f32.mrb[3].mxu0 }
 0x579   :  { %v894_v22 = vsel %vm234_vm2, %v817_v61, 0.0  ;;  %v904_v47 = vmul.f32 %v817_v61, %v817_v61 }
 0x57a   :  { %v907_v1 = vsel %vm234_vm2, %v903_v35, 0.0  ;;  %v895_v49 = vadd.f32 %v894_v22, %v893_v60 }
 0x57b   :  { %v908_v45 = vsel %vm234_vm2, %v904_v47, 0.0 }
 0x57c   :  { %v909_v42 = vadd.f32 %v908_v45, %v907_v1  ;;  %v886_v18 = vpop.f32.mrb[2].mxu1 }
 0x57d   :  { %v896_v6 = vsel %vm234_vm2, %v886_v18, 0.0  ;;  %v905_v27 = vmul.f32 %v886_v18, %v886_v18  ;;  %v888_v58 = vpop.f32.mrb[3].mxu1 }
 0x57e   :  { %v898_v11 = vsel %vm234_vm2, %v888_v58, 0.0  ;;  %v906_v7 = vmul.f32 %v888_v58, %v888_v58  ;;  %v897_v12 = vadd.f32 %v896_v6, %v895_v49 }
 0x57f   :  { %v910_v19 = vsel %vm234_vm2, %v905_v27, 0.0 }
 0x580   :  { %v912_v54 = vsel %vm234_vm2, %v906_v7, 0.0  ;;  %v899_v55 = vadd.f32 %v898_v11, %v897_v12  ;;  %v911_v16 = vadd.f32 %v910_v19, %v909_v42 }
 0x582   :  { %900 = vadd.xlane.f32.xlu0 %v899_v55  ;;  %v913_v30 = vadd.f32 %v912_v54, %v911_v16 }
 0x584   :  { %914 = vadd.xlane.f32.xlu1 %v913_v30 }
 0x60f   :  { %v901_v9 = vpop.xlane.xlu0 %900 }
 0x610   :  { %v902_v63 = vmul.f32 0.001953125, %v901_v9 }
 0x611   :  { %v915_v0 = vpop.xlane.xlu1 %914 }
 0x612   :  { %v917_v56 = vmul.f32 %v902_v63, %v902_v63  ;;  %v916_v2 = vmul.f32 0.001953125, %v915_v0 }
 0x614   :  { %v918_v28 = vsub.f32 %v916_v2, %v917_v56 }
 0x616   :  { %v919_v59 = vadd.f32 1e-05, %v918_v28 }
 0x618   :  { %1035 = vrsqrt.f32 %v919_v59 }
 0x622   :  { %v1036_v21 = vpop.eup %1035 }
 0x623   :  { %v921_v57 = vmul.f32 %v1036_v21, %v891_v15 }
 0x625   :  { %926 = vperm.xlu0 %1013, %v921_v57   ;;  %v922_v62 = vmul.f32 %v921_v57, %v902_v63 }
 0x627   :  { %v923_v23 = vsub.f32 %v892_v3, %v922_v62 }
 0x629   :  { %935 = vperm.xlu1 %1014, %v923_v23  }
 0x6a4   :  { %v927_v24 = vpop.permute.xlu0 %926 }
 0x6a5   :  { %v929_v20 = vmul.f32 %v927_v24, %v815_v10  ;;  %v930_v46 = vmul.f32 %v927_v24, %v817_v61  ;;  %v931_v33 = vmul.f32 %v927_v24, %v886_v18  ;;  %v932_v52 = vmul.f32 %v927_v24, %v888_v58 }
 0x6a8   :  { %v936_v50 = vpop.permute.xlu1 %935 }
 0x6a9   :  { %v938_v17 = vadd.f32 %v936_v50, %v929_v20  ;;  %v939_v41 = vadd.f32 %v936_v50, %v930_v46  ;;  %v940_v34 = vadd.f32 %v936_v50, %v931_v33  ;;  %v941_v4 = vadd.f32 %v936_v50, %v932_v52 }
 0x6ab   :  { %v946_v14 = vcombine.low %v938_v17, %v939_v41  ;;  %v947_v13 = vcombine.low %v940_v34, %v941_v4 }
 0x6ad   :  { %v950_v48 = vadd.f32 %v1037_v44, %v946_v14  ;;  %v951_v51 = vadd.f32 %v1038_v8, %v947_v13 }
 0x6af   :  { %952 = vst [vmem:[%s1660_s8] sm:$0xff] %v950_v48  ;;  %953 = vst [vmem:[%s1660_s8 + $0x8] sm:$0xff] %v951_v51 }

</bundles_post_ra>
